<compile_context>
chip_gen: v5e
topology: v5e:2x2
jax: 0.10.0
libtpu: 0.0.40
codegen_flags: <defaults>
</compile_context>

<pallas_src>
import jax
import jax.numpy as jnp
from jax.experimental import pallas as pl
from jax.experimental.pallas import tpu as pltpu


def round_up(n, m):
    return ((n + m - 1) // m) * m


# ----------------------------------------------------------------------------
# MADE mask construction (deterministic, identity input ordering) -- built on the
# UNPADDED D/H so the autoregressive property is preserved after padding.
# ----------------------------------------------------------------------------
def make_masks(D, H, n_params=2):
    deg_in = jnp.arange(1, D + 1)
    deg_h = (jnp.arange(H) % max(D - 1, 1)) + 1
    m1 = (deg_h[None, :] >= deg_in[:, None]).astype(jnp.float32)   # (D, H)
    m2 = (deg_h[None, :] >= deg_h[:, None]).astype(jnp.float32)    # (H, H)
    deg_out = jnp.tile(jnp.arange(1, D + 1), n_params)
    m3 = (deg_out[None, :] > deg_h[:, None]).astype(jnp.float32)   # (H, 2D)
    return m1, m2, m3


def init_params(key, D, H):
    k1, k2, k3 = jax.random.split(key, 3)
    s1 = 1.0 / jnp.sqrt(D)
    s2 = 1.0 / jnp.sqrt(H)
    w1 = jax.random.uniform(k1, (D, H), jnp.float32, -s1, s1)
    b1 = jnp.zeros((1, H), jnp.float32)
    w2 = jax.random.uniform(k2, (H, H), jnp.float32, -s2, s2)
    b2 = jnp.zeros((1, H), jnp.float32)
    w3 = jax.random.uniform(k3, (H, 2 * D), jnp.float32, -s2, s2)
    b3 = jnp.zeros((1, 2 * D), jnp.float32)
    m1, m2, m3 = make_masks(D, H, n_params=2)
    return (m1, w1, b1, m2, w2, b2, m3, w3, b3)


# ----------------------------------------------------------------------------
# One-time parameter preparation: fold masks, fuse the output layer's mean /
# log_scale halves into one lane-dense (Hp, 2*Dp) matrix, zero-pad H (and the
# output halves) to multiples of 128, and cast the matmul operands to bfloat16.
# The input dimension D is NOT padded (x is consumed unpadded).
# ----------------------------------------------------------------------------
def prepare_params(raw_params, D, H, compute_dtype=jnp.bfloat16):
    m1, w1, b1, m2, w2, b2, m3, w3, b3 = raw_params
    Dp = round_up(D, 128)
    Hp = round_up(H, 128)

    w1m = w1 * m1                       # (D, H)
    w2m = w2 * m2                       # (H, H)
    w3m = w3 * m3                       # (H, 2D); param p lives in cols [p*D, (p+1)*D)

    def pad2(a, rows, cols):
        return jnp.pad(a, ((0, rows - a.shape[0]), (0, cols - a.shape[1])))

    w1p = pad2(w1m, D, Hp).astype(compute_dtype)          # (D, Hp)  -- D unpadded
    w2p = pad2(w2m, Hp, Hp).astype(compute_dtype)         # (Hp, Hp)
    # Fused output layer: [mean half padded to Dp | log_scale half padded to Dp].
    w3p = jnp.concatenate(
        [pad2(w3m[:, :D], Hp, Dp), pad2(w3m[:, D:2 * D], Hp, Dp)], axis=1
    ).astype(compute_dtype)                                # (Hp, 2*Dp)

    b1p = pad2(b1, 1, Hp).astype(jnp.float32)
    b2p = pad2(b2, 1, Hp).astype(jnp.float32)
    b3p = jnp.concatenate(
        [pad2(b3[:, :D], 1, Dp), pad2(b3[:, D:2 * D], 1, Dp)], axis=1
    ).astype(jnp.float32)                                  # (1, 2*Dp)

    return (w1p, b1p, w2p, b2p, w3p, b3p)


# ----------------------------------------------------------------------------
# Pallas kernel: masked-MLP forward for one batch tile.
# Weights come in pre-masked / pre-fused; dots accumulate in f32 on the MXU,
# bias + ReLU epilogue stays in f32, activations are cast back to bf16 only for
# the next MXU pass.  A single N=2*Dp dot writes one full-width lane-dense tile.
# ----------------------------------------------------------------------------
def made_kernel(x_ref, w1_ref, b1_ref, w2_ref, b2_ref, w3_ref, b3_ref, out_ref):
    x = x_ref[...].astype(w1_ref.dtype)          # cast f32 -> bf16 in VMEM (cheap, VPU)

    h1 = jnp.dot(x, w1_ref[...], preferred_element_type=jnp.float32) + b1_ref[...]
    h1 = jnp.maximum(h1, 0.0).astype(w2_ref.dtype)

    h2 = jnp.dot(h1, w2_ref[...], preferred_element_type=jnp.float32) + b2_ref[...]
    h2 = jnp.maximum(h2, 0.0).astype(w3_ref.dtype)

    y = jnp.dot(h2, w3_ref[...], preferred_element_type=jnp.float32) + b3_ref[...]
    out_ref[...] = y.astype(out_ref.dtype)


def _vmem_limit_bytes():
    # ~96 MiB on v5e/v6e (128 MiB physical), ~48 MiB on v7x (64 MiB physical).
    try:
        cap = pltpu.get_tpu_info().vmem_capacity_bytes
    except Exception:
        cap = 64 * 1024 * 1024
    return int(min((cap * 3) // 4, 100 * 1024 * 1024))


# ----------------------------------------------------------------------------
# Wrapper: builds the batch grid, resident-weight BlockSpecs, and invokes
# pallas_call.  Returns (mean, log_scale) like ParamsModule.forward.
# ----------------------------------------------------------------------------
def params_module_forward(x, prepared, unpadded_d, context=None,
                          out_dtype=jnp.bfloat16):
    # TODO(synk): context conditioning (context_dims > 0) not supported; the default
    #             flowtorch DenseAutoregressive configuration ignores context.
    assert context is None, "context conditioning is not supported by this kernel"
    w1, b1, w2, b2, w3, b3 = prepared
    B, D = x.shape
    assert D == unpadded_d == w1.shape[0]
    Hp = w1.shape[1]
    two_dp = w3.shape[1]
    Dp = two_dp // 2

    # Batch tiling: minimize padding, target ~512-row tiles (v5e/v6e roofline),
    # and use >=2 tiles for B >= 16 so the grid can shard across both v7x cores.
    target_tb = 512
    n_tiles = max(1, pl.cdiv(B, target_tb))
    if n_tiles == 1 and B >= 16:
        n_tiles = 2
    TB = round_up(pl.cdiv(B, n_tiles), 8)
    Bp = n_tiles * TB

    # Only the batch axis is (minimally) padded; D is consumed unpadded.
    xp = x if Bp == B else jnp.pad(x, ((0, Bp - B), (0, 0)))

    flops = 2 * Bp * (D * Hp + Hp * Hp + Hp * two_dp)
    bytes_accessed = (
        xp.size * xp.dtype.itemsize
        + sum(a.size * a.dtype.itemsize for a in prepared)
        + Bp * two_dp * jnp.dtype(out_dtype).itemsize
    )
    cost = pl.CostEstimate(flops=flops, transcendentals=0,
                           bytes_accessed=bytes_accessed)
    cparams = pltpu.CompilerParams(
        dimension_semantics=("parallel",),        # shard batch tiles across TCs (v7x)
        vmem_limit_bytes=_vmem_limit_bytes(),
    )

    # TODO(synk): for H >~ 2K, add a K grid axis over Hp ("arbitrary") with an f32
    #             accumulator instead of keeping w2 fully resident (v7x 64 MiB VMEM).
    def call_with(resident_mode):
        # Weights / biases: whole-array blocks with a constant index_map -> resident
        # in VMEM across all grid iterations (never refetched).
        def resident(a):
            idx = lambda i: (0,) * a.ndim
            if resident_mode is None:
                return pl.BlockSpec(a.shape, idx)
            return pl.BlockSpec(a.shape, idx, pipeline_mode=resident_mode)

        return pl.pallas_call(
            made_kernel,
            out_shape=jax.ShapeDtypeStruct((Bp, two_dp), out_dtype),
            grid=(n_tiles,),
            in_specs=[
                pl.BlockSpec((TB, D), lambda i: (i, 0)),   # x: pipelined batch tiles
                resident(w1), resident(b1),
                resident(w2), resident(b2),
                resident(w3), resident(b3),
            ],
            out_specs=pl.BlockSpec((TB, two_dp), lambda i: (i, 0)),
            compiler_params=cparams,
            cost_estimate=cost,
        )(xp, w1, b1, w2, b2, w3, b3)

    try:
        # Single-buffer the resident weights (constant index_map -> no refetch);
        # halves resident-weight VMEM, which matters on v7x's 64 MiB.
        out = call_with(pl.Buffered(1))
    except Exception:
        # Fallback for runtimes that reject single-buffered pipeline_mode.
        out = call_with(None)

    # ParamsModule.forward returns a Sequence[Tensor] -> (mean, log_scale).
    # Split the fused output at the 128-lane boundary; padded lanes are zero.
    mean = out[:B, :D]
    log_scale = out[:B, Dp:Dp + D]
    return mean, log_scale


# ----------------------------------------------------------------------------
# References:
#  (a) same prepared bf16 weights, f32 accumulation -> validates the Pallas lowering
#  (b) full f32 with the raw masked weights -> validates fidelity vs. the original
#      f32 flowtorch-style hypernetwork
# ----------------------------------------------------------------------------
def reference_forward_prepared(x, prepared, D, Dp):
    w1, b1, w2, b2, w3, b3 = prepared
    xb = x.astype(w1.dtype)
    h1 = jnp.maximum(
        jnp.dot(xb, w1, preferred_element_type=jnp.float32) + b1, 0.0).astype(w1.dtype)
    h2 = jnp.maximum(
        jnp.dot(h1, w2, preferred_element_type=jnp.float32) + b2, 0.0).astype(w1.dtype)
    out = jnp.dot(h2, w3, preferred_element_type=jnp.float32) + b3
    return out[:, :D], out[:, Dp:Dp + D]


def reference_forward_f32(x, raw_params, D):
    m1, w1, b1, m2, w2, b2, m3, w3, b3 = raw_params
    h1 = jnp.maximum(x @ (w1 * m1) + b1, 0.0)
    h2 = jnp.maximum(h1 @ (w2 * m2) + b2, 0.0)
    out = h2 @ (w3 * m3) + b3
    return out[:, :D], out[:, D:2 * D]


if __name__ == "__main__":
    B, D, H = 8, 8, 32
    key = jax.random.PRNGKey(0)
    kx, kp = jax.random.split(key)
    x = jax.random.normal(kx, (B, D), jnp.float32)

    raw = init_params(kp, D, H)
    prepared = prepare_params(raw, D, H)      # one-time: fold masks, fuse w3, pad, bf16

    mean, log_scale = params_module_forward(x, prepared, D)
    jax.block_until_ready((mean, log_scale))

    assert mean.shape == (B, D) and log_scale.shape == (B, D)

    Dp = round_up(D, 128)
    ref_mean_b, ref_ls_b = reference_forward_prepared(x, prepared, D, Dp)
    assert jnp.allclose(mean.astype(jnp.float32), ref_mean_b, atol=2e-2, rtol=2e-2)
    assert jnp.allclose(log_scale.astype(jnp.float32), ref_ls_b, atol=2e-2, rtol=2e-2)

    ref_mean_f, ref_ls_f = reference_forward_f32(x, raw, D)
    assert jnp.allclose(mean.astype(jnp.float32), ref_mean_f, atol=5e-2, rtol=5e-2)
    assert jnp.allclose(log_scale.astype(jnp.float32), ref_ls_f, atol=5e-2, rtol=5e-2)

    print("KERNEL_OK")
</pallas_src>

<mosaic_0001>
module attributes {stable_mosaic.version = 11 : i64} {
  func.func @made_kernel(%arg0: i32, %arg1: memref<8x8xf32, #tpu.memory_space<vmem>>, %arg2: memref<8x128xbf16, #tpu.memory_space<vmem>>, %arg3: memref<1x128xf32, #tpu.memory_space<vmem>>, %arg4: memref<128x128xbf16, #tpu.memory_space<vmem>>, %arg5: memref<1x128xf32, #tpu.memory_space<vmem>>, %arg6: memref<128x256xbf16, #tpu.memory_space<vmem>>, %arg7: memref<1x256xf32, #tpu.memory_space<vmem>>, %arg8: memref<8x256xbf16, #tpu.memory_space<vmem>>) attributes {dimension_semantics = [#tpu.dimension_semantics<parallel>], iteration_bounds = array<i64: 1>, scalar_prefetch = 0 : i64, scratch_operands = 0 : i64, tpu.core_type = #tpu.core_type<tc>, window_params = [{transform_indices = @transform_0, window_bounds = array<i64: 8, 8>}, {pipeline_mode = #tpu.pipeline_mode<synchronous>, transform_indices = @transform_1, window_bounds = array<i64: 8, 128>}, {pipeline_mode = #tpu.pipeline_mode<synchronous>, transform_indices = @transform_2, window_bounds = array<i64: 1, 128>}, {pipeline_mode = #tpu.pipeline_mode<synchronous>, transform_indices = @transform_3, window_bounds = array<i64: 128, 128>}, {pipeline_mode = #tpu.pipeline_mode<synchronous>, transform_indices = @transform_4, window_bounds = array<i64: 1, 128>}, {pipeline_mode = #tpu.pipeline_mode<synchronous>, transform_indices = @transform_5, window_bounds = array<i64: 128, 256>}, {pipeline_mode = #tpu.pipeline_mode<synchronous>, transform_indices = @transform_6, window_bounds = array<i64: 1, 256>}, {transform_indices = @transform_7, window_bounds = array<i64: 8, 256>}]} {
    %c0 = arith.constant 0 : index
    %c0_0 = arith.constant 0 : index
    %0 = vector.load %arg1[%c0, %c0_0] : memref<8x8xf32, #tpu.memory_space<vmem>>, vector<8x8xf32>
    %1 = arith.truncf %0 : vector<8x8xf32> to vector<8x8xbf16>
    %c0_1 = arith.constant 0 : index
    %c0_2 = arith.constant 0 : index
    %2 = vector.load %arg2[%c0_1, %c0_2] : memref<8x128xbf16, #tpu.memory_space<vmem>>, vector<8x128xbf16>
    %cst = arith.constant dense<0.000000e+00> : vector<8x128xf32>
    %3 = tpu.matmul %1, %2, %cst {dimension_numbers = #tpu.dot_dimension_numbers<[1], [0], [0], [1], [0, 0, 1, 1], [], []>} : vector<8x8xbf16>, vector<8x128xbf16>, vector<8x128xf32> -> vector<8x128xf32>
    %c0_3 = arith.constant 0 : index
    %c0_4 = arith.constant 0 : index
    %4 = vector.load %arg3[%c0_3, %c0_4] : memref<1x128xf32, #tpu.memory_space<vmem>>, vector<1x128xf32>
    %5 = vector.broadcast %4 : vector<1x128xf32> to vector<8x128xf32>
    %6 = arith.addf %3, %5 : vector<8x128xf32>
    %cst_5 = arith.constant 0.000000e+00 : f32
    %7 = vector.broadcast %cst_5 : f32 to vector<8x128xf32>
    %8 = arith.maximumf %6, %7 : vector<8x128xf32>
    %9 = arith.truncf %8 : vector<8x128xf32> to vector<8x128xbf16>
    %c0_6 = arith.constant 0 : index
    %c0_7 = arith.constant 0 : index
    %10 = vector.load %arg4[%c0_6, %c0_7] : memref<128x128xbf16, #tpu.memory_space<vmem>>, vector<128x128xbf16>
    %cst_8 = arith.constant dense<0.000000e+00> : vector<8x128xf32>
    %11 = tpu.matmul %9, %10, %cst_8 {dimension_numbers = #tpu.dot_dimension_numbers<[1], [0], [0], [1], [0, 0, 1, 1], [], []>} : vector<8x128xbf16>, vector<128x128xbf16>, vector<8x128xf32> -> vector<8x128xf32>
    %c0_9 = arith.constant 0 : index
    %c0_10 = arith.constant 0 : index
    %12 = vector.load %arg5[%c0_9, %c0_10] : memref<1x128xf32, #tpu.memory_space<vmem>>, vector<1x128xf32>
    %13 = vector.broadcast %12 : vector<1x128xf32> to vector<8x128xf32>
    %14 = arith.addf %11, %13 : vector<8x128xf32>
    %cst_11 = arith.constant 0.000000e+00 : f32
    %15 = vector.broadcast %cst_11 : f32 to vector<8x128xf32>
    %16 = arith.maximumf %14, %15 : vector<8x128xf32>
    %17 = arith.truncf %16 : vector<8x128xf32> to vector<8x128xbf16>
    %c0_12 = arith.constant 0 : index
    %c0_13 = arith.constant 0 : index
    %18 = vector.load %arg6[%c0_12, %c0_13] : memref<128x256xbf16, #tpu.memory_space<vmem>>, vector<128x256xbf16>
    %cst_14 = arith.constant dense<0.000000e+00> : vector<8x256xf32>
    %19 = tpu.matmul %17, %18, %cst_14 {dimension_numbers = #tpu.dot_dimension_numbers<[1], [0], [0], [1], [0, 0, 1, 1], [], []>} : vector<8x128xbf16>, vector<128x256xbf16>, vector<8x256xf32> -> vector<8x256xf32>
    %c0_15 = arith.constant 0 : index
    %c0_16 = arith.constant 0 : index
    %20 = vector.load %arg7[%c0_15, %c0_16] : memref<1x256xf32, #tpu.memory_space<vmem>>, vector<1x256xf32>
    %21 = vector.broadcast %20 : vector<1x256xf32> to vector<8x256xf32>
    %22 = arith.addf %19, %21 : vector<8x256xf32>
    %23 = arith.truncf %22 : vector<8x256xf32> to vector<8x256xbf16>
    %c0_17 = arith.constant 0 : index
    %c0_18 = arith.constant 0 : index
    %24 = vector.load %arg8[%c0_17, %c0_18] : memref<8x256xbf16, #tpu.memory_space<vmem>>, vector<8x256xbf16>
    tpu.vector_store %arg8[%c0_17, %c0_18], %23 {strides = array<i32>} : memref<8x256xbf16, #tpu.memory_space<vmem>>, vector<8x256xbf16>,
    return
  }
  func.func @transform_0(%arg0: i32) -> (i32, i32) {
    %c0_i32 = arith.constant 0 : i32
    %c0_i32_0 = arith.constant 0 : i32
    return %arg0, %c0_i32 : i32, i32
  }
  func.func @transform_1(%arg0: i32) -> (i32, i32) {
    %c0_i32 = arith.constant 0 : i32
    %c0_i32_0 = arith.constant 0 : i32
    %c0_i32_1 = arith.constant 0 : i32
    return %c0_i32, %c0_i32_0 : i32, i32
  }
  func.func @transform_2(%arg0: i32) -> (i32, i32) {
    %c0_i32 = arith.constant 0 : i32
    %c0_i32_0 = arith.constant 0 : i32
    %c0_i32_1 = arith.constant 0 : i32
    return %c0_i32, %c0_i32_0 : i32, i32
  }
  func.func @transform_3(%arg0: i32) -> (i32, i32) {
    %c0_i32 = arith.constant 0 : i32
    %c0_i32_0 = arith.constant 0 : i32
    %c0_i32_1 = arith.constant 0 : i32
    return %c0_i32, %c0_i32_0 : i32, i32
  }
  func.func @transform_4(%arg0: i32) -> (i32, i32) {
    %c0_i32 = arith.constant 0 : i32
    %c0_i32_0 = arith.constant 0 : i32
    %c0_i32_1 = arith.constant 0 : i32
    return %c0_i32, %c0_i32_0 : i32, i32
  }
  func.func @transform_5(%arg0: i32) -> (i32, i32) {
    %c0_i32 = arith.constant 0 : i32
    %c0_i32_0 = arith.constant 0 : i32
    %c0_i32_1 = arith.constant 0 : i32
    return %c0_i32, %c0_i32_0 : i32, i32
  }
  func.func @transform_6(%arg0: i32) -> (i32, i32) {
    %c0_i32 = arith.constant 0 : i32
    %c0_i32_0 = arith.constant 0 : i32
    %c0_i32_1 = arith.constant 0 : i32
    return %c0_i32, %c0_i32_0 : i32, i32
  }
  func.func @transform_7(%arg0: i32) -> (i32, i32) {
    %c0_i32 = arith.constant 0 : i32
    %c0_i32_0 = arith.constant 0 : i32
    return %arg0, %c0_i32 : i32, i32
  }
}

module attributes {stable_mosaic.version = 11 : i64} {
  func.func @made_kernel(%arg0: i32, %arg1: memref<8x8xf32, #tpu.memory_space<vmem>>, %arg2: memref<8x128xbf16, #tpu.memory_space<vmem>>, %arg3: memref<1x128xf32, #tpu.memory_space<vmem>>, %arg4: memref<128x128xbf16, #tpu.memory_space<vmem>>, %arg5: memref<1x128xf32, #tpu.memory_space<vmem>>, %arg6: memref<128x256xbf16, #tpu.memory_space<vmem>>, %arg7: memref<1x256xf32, #tpu.memory_space<vmem>>, %arg8: memref<8x256xbf16, #tpu.memory_space<vmem>>) attributes {dimension_semantics = [#tpu.dimension_semantics<parallel>], iteration_bounds = array<i64: 1>, scalar_prefetch = 0 : i64, scratch_operands = 0 : i64, tpu.core_type = #tpu.core_type<tc>, window_params = [{transform_indices = @transform_0, window_bounds = array<i64: 8, 8>}, {pipeline_mode = #tpu.pipeline_mode<synchronous>, transform_indices = @transform_1, window_bounds = array<i64: 8, 128>}, {pipeline_mode = #tpu.pipeline_mode<synchronous>, transform_indices = @transform_2, window_bounds = array<i64: 1, 128>}, {pipeline_mode = #tpu.pipeline_mode<synchronous>, transform_indices = @transform_3, window_bounds = array<i64: 128, 128>}, {pipeline_mode = #tpu.pipeline_mode<synchronous>, transform_indices = @transform_4, window_bounds = array<i64: 1, 128>}, {pipeline_mode = #tpu.pipeline_mode<synchronous>, transform_indices = @transform_5, window_bounds = array<i64: 128, 256>}, {pipeline_mode = #tpu.pipeline_mode<synchronous>, transform_indices = @transform_6, window_bounds = array<i64: 1, 256>}, {transform_indices = @transform_7, window_bounds = array<i64: 8, 256>}]} {
    %c0 = arith.constant 0 : index
    %c0_0 = arith.constant 0 : index
    %0 = vector.load %arg1[%c0, %c0_0] : memref<8x8xf32, #tpu.memory_space<vmem>>, vector<8x8xf32>
    %1 = arith.truncf %0 : vector<8x8xf32> to vector<8x8xbf16>
    %c0_1 = arith.constant 0 : index
    %c0_2 = arith.constant 0 : index
    %2 = vector.load %arg2[%c0_1, %c0_2] : memref<8x128xbf16, #tpu.memory_space<vmem>>, vector<8x128xbf16>
    %cst = arith.constant dense<0.000000e+00> : vector<8x128xf32>
    %3 = tpu.matmul %1, %2, %cst {dimension_numbers = #tpu.dot_dimension_numbers<[1], [0], [0], [1], [0, 0, 1, 1], [], []>} : vector<8x8xbf16>, vector<8x128xbf16>, vector<8x128xf32> -> vector<8x128xf32>
    %c0_3 = arith.constant 0 : index
    %c0_4 = arith.constant 0 : index
    %4 = vector.load %arg3[%c0_3, %c0_4] : memref<1x128xf32, #tpu.memory_space<vmem>>, vector<1x128xf32>
    %5 = vector.broadcast %4 : vector<1x128xf32> to vector<8x128xf32>
    %6 = arith.addf %3, %5 : vector<8x128xf32>
    %cst_5 = arith.constant 0.000000e+00 : f32
    %7 = vector.broadcast %cst_5 : f32 to vector<8x128xf32>
    %8 = arith.maximumf %6, %7 : vector<8x128xf32>
    %9 = arith.truncf %8 : vector<8x128xf32> to vector<8x128xbf16>
    %c0_6 = arith.constant 0 : index
    %c0_7 = arith.constant 0 : index
    %10 = vector.load %arg4[%c0_6, %c0_7] : memref<128x128xbf16, #tpu.memory_space<vmem>>, vector<128x128xbf16>
    %cst_8 = arith.constant dense<0.000000e+00> : vector<8x128xf32>
    %11 = tpu.matmul %9, %10, %cst_8 {dimension_numbers = #tpu.dot_dimension_numbers<[1], [0], [0], [1], [0, 0, 1, 1], [], []>} : vector<8x128xbf16>, vector<128x128xbf16>, vector<8x128xf32> -> vector<8x128xf32>
    %c0_9 = arith.constant 0 : index
    %c0_10 = arith.constant 0 : index
    %12 = vector.load %arg5[%c0_9, %c0_10] : memref<1x128xf32, #tpu.memory_space<vmem>>, vector<1x128xf32>
    %13 = vector.broadcast %12 : vector<1x128xf32> to vector<8x128xf32>
    %14 = arith.addf %11, %13 : vector<8x128xf32>
    %cst_11 = arith.constant 0.000000e+00 : f32
    %15 = vector.broadcast %cst_11 : f32 to vector<8x128xf32>
    %16 = arith.maximumf %14, %15 : vector<8x128xf32>
    %17 = arith.truncf %16 : vector<8x128xf32> to vector<8x128xbf16>
    %c0_12 = arith.constant 0 : index
    %c0_13 = arith.constant 0 : index
    %18 = vector.load %arg6[%c0_12, %c0_13] : memref<128x256xbf16, #tpu.memory_space<vmem>>, vector<128x256xbf16>
    %cst_14 = arith.constant dense<0.000000e+00> : vector<8x256xf32>
    %19 = tpu.matmul %17, %18, %cst_14 {dimension_numbers = #tpu.dot_dimension_numbers<[1], [0], [0], [1], [0, 0, 1, 1], [], []>} : vector<8x128xbf16>, vector<128x256xbf16>, vector<8x256xf32> -> vector<8x256xf32>
    %c0_15 = arith.constant 0 : index
    %c0_16 = arith.constant 0 : index
    %20 = vector.load %arg7[%c0_15, %c0_16] : memref<1x256xf32, #tpu.memory_space<vmem>>, vector<1x256xf32>
    %21 = vector.broadcast %20 : vector<1x256xf32> to vector<8x256xf32>
    %22 = arith.addf %19, %21 : vector<8x256xf32>
    %23 = arith.truncf %22 : vector<8x256xf32> to vector<8x256xbf16>
    %c0_17 = arith.constant 0 : index
    %c0_18 = arith.constant 0 : index
    %24 = vector.load %arg8[%c0_17, %c0_18] : memref<8x256xbf16, #tpu.memory_space<vmem>>, vector<8x256xbf16>
    tpu.vector_store %arg8[%c0_17, %c0_18], %23 {strides = array<i32>} : memref<8x256xbf16, #tpu.memory_space<vmem>>, vector<8x256xbf16>,
    return
  }
  func.func @transform_0(%arg0: i32) -> (i32, i32) {
    %c0_i32 = arith.constant 0 : i32
    %c0_i32_0 = arith.constant 0 : i32
    return %arg0, %c0_i32 : i32, i32
  }
  func.func @transform_1(%arg0: i32) -> (i32, i32) {
    %c0_i32 = arith.constant 0 : i32
    %c0_i32_0 = arith.constant 0 : i32
    %c0_i32_1 = arith.constant 0 : i32
    return %c0_i32, %c0_i32_0 : i32, i32
  }
  func.func @transform_2(%arg0: i32) -> (i32, i32) {
    %c0_i32 = arith.constant 0 : i32
    %c0_i32_0 = arith.constant 0 : i32
    %c0_i32_1 = arith.constant 0 : i32
    return %c0_i32, %c0_i32_0 : i32, i32
  }
  func.func @transform_3(%arg0: i32) -> (i32, i32) {
    %c0_i32 = arith.constant 0 : i32
    %c0_i32_0 = arith.constant 0 : i32
    %c0_i32_1 = arith.constant 0 : i32
    return %c0_i32, %c0_i32_0 : i32, i32
  }
  func.func @transform_4(%arg0: i32) -> (i32, i32) {
    %c0_i32 = arith.constant 0 : i32
    %c0_i32_0 = arith.constant 0 : i32
    %c0_i32_1 = arith.constant 0 : i32
    return %c0_i32, %c0_i32_0 : i32, i32
  }
  func.func @transform_5(%arg0: i32) -> (i32, i32) {
    %c0_i32 = arith.constant 0 : i32
    %c0_i32_0 = arith.constant 0 : i32
    %c0_i32_1 = arith.constant 0 : i32
    return %c0_i32, %c0_i32_0 : i32, i32
  }
  func.func @transform_6(%arg0: i32) -> (i32, i32) {
    %c0_i32 = arith.constant 0 : i32
    %c0_i32_0 = arith.constant 0 : i32
    %c0_i32_1 = arith.constant 0 : i32
    return %c0_i32, %c0_i32_0 : i32, i32
  }
  func.func @transform_7(%arg0: i32) -> (i32, i32) {
    %c0_i32 = arith.constant 0 : i32
    %c0_i32_0 = arith.constant 0 : i32
    return %arg0, %c0_i32 : i32, i32
  }
}

</mosaic_0001>

<bundles_post_ra>
// kernel: tpu_custom_call.1
= control target key start
LH: loop header
LB: loop body
LE: loop exit
PB: predicated region body
PF: predicated region fallthrough
CT: control target
= control target key end

     0   :  { %12 = vsyncpa [#allocation3], 0  ;;  %s721_s0 = inlined_call_operand.hbm [shape: f32[8,8], index: 0, kind: input, shape index: {}]   ;;  %s722_s1 = inlined_call_operand.hbm [shape: bf16[8,128], index: 1, kind: input, shape index: {}]   ;;  %s723_s2 = inlined_call_operand.vmem [shape: f32[1,128], index: 2, kind: input, shape index: {}]   ;;  %s724_s3 = inlined_call_operand.hbm [shape: bf16[128,128], index: 3, kind: input, shape index: {}]   ;;  %s725_s4 = inlined_call_operand.hbm [shape: f32[1,128], index: 4, kind: input, shape index: {}]   ;;  %s726_s5 = inlined_call_operand.hbm [shape: bf16[128,256], index: 5, kind: input, shape index: {}]   ;;  %s727_s6 = inlined_call_operand.vmem [shape: f32[1,256], index: 6, kind: input, shape index: {}]   ;;  %s728_s7 = inlined_call_operand.hbm [shape: bf16[8,256], index: 7, kind: output, shape index: {}]  }
   0x1   :  { %13 = vsyncpa [#allocation6], 0 }
   0x2   :  { %14 = vsyncpa [#allocation9], 0  ;;  %s32_s26 = sshll.u32 %s722_s1, 4  ;;  %s33_s26 = int_to_ptr.hbm [resolvable:$true] %s32_s26 }
   0x3   :  { %15 = vsyncpa [#allocation4], 0  ;;  %s647_s27 = smov [#allocation5]   ;;  %s58_s8 = sshll.u32 %s725_s4, 4  ;;  %s59_s8 = int_to_ptr.hbm [resolvable:$true] %s58_s8 }
   0x4   :  { %s34_s28 = sshll.u32 %s647_s27, 4  ;;  %s648_s9 = smov [#allocation8]   ;;  %s35_s28 = int_to_ptr.vmem [resolvable:$true] %s34_s28 }
   0x5   :  { %37 = dma.hbm_to_vmem [thread:$0]  %s33_s26, 64, %s35_s28, [#allocation6]  }
   0x6   :  { %s60_s10 = sshll.u32 %s648_s9, 4  ;;  %s21_s13 = sshll.u32 %s721_s0, 4  ;;  %s61_s10 = int_to_ptr.vmem [resolvable:$true] %s60_s10  ;;  %s22_s13 = int_to_ptr.hbm [resolvable:$true] %s21_s13 }
   0x7   :  { %63 = dma.hbm_to_vmem [thread:$0]  %s59_s8, 16, %s61_s10, [#allocation9]  }
   0x8   :  { %s44_s15 = sshll.u32 %s724_s3, 4  ;;  %s649_s16 = smov [#allocation2]   ;;  %s45_s15 = int_to_ptr.hbm [resolvable:$true] %s44_s15 }
   0x9   :  { %s23_s17 = sshll.u32 %s649_s16, 4  ;;  %s650_s4 = smov [#allocation7]   ;;  %s24_s17 = int_to_ptr.vmem [resolvable:$true] %s23_s17 }
   0xa   :  { %26 = dma.hbm_to_vmem [thread:$0]  %s22_s13, 128, %s24_s17, [#allocation3]  }
   0xb   :  { %s46_s18 = sshll.u32 %s650_s4, 4  ;;  %s651_s19 = smov 64   ;;  %s47_s18 = int_to_ptr.vmem [resolvable:$true] %s46_s18 }
   0xc   :  { %s652_s20 = smov 4   ;;  %s68_s22 = sshll.u32 %s726_s5, 4  ;;  %s69_s22 = int_to_ptr.hbm [resolvable:$true] %s68_s22 }
   0xd   :  { %52 = dma.hbm_to_vmem [thread:$0]  %s45_s15, 1024, %s47_s18, [#allocation6], %s651_s19, %s651_s19, %s652_s20  }
   0xe   :  { %s653_s23 = smov [#allocation10]   ;;  %s654_s3 = smov 128  }
   0xf   :  { %s70_s24 = sshll.u32 %s653_s23, 4  ;;  %s655_s25 = smov 8   ;;  %s71_s24 = int_to_ptr.vmem [resolvable:$true] %s70_s24 }
  0x10   :  { %76 = dma.hbm_to_vmem [thread:$0]  %s69_s22, 2048, %s71_s24, [#allocation9], %s654_s3, %s654_s3, %s655_s25  }
  0x11   :  { %639 = dma.done.wait [#allocation3], 128  }
  0x12   :  { %640 = vsyncadd [#allocation3], 4294967168 }
  0x13   :  { %641 = dma.done.wait [#allocation6], 1088  }
  0x14   :  { %642 = vsyncadd [#allocation6], 4294966208 }
  0x15   :  { %643 = dma.done.wait [#allocation9], 2064  }
  0x16   :  { %644 = vsyncadd [#allocation9], 4294965232  ;;  %vm111_vm0 = vcmask 1043456   ;;  %v102_v0 = vld [vmem:[#allocation5] sm:$0xf]  ;;  %v100_v1 = vld [vmem:[#allocation2] sm:$0xff] }
  0x17   :  { %v466_v2 = vld [vmem:[#allocation7 + $0x38] sm:$0xff]  ;;  %v113_v3 = vsel %vm111_vm0, %v102_v0, 0  ;;  %v101_v4 = vpack.c.bf16 %v100_v1, %v100_v1  ;;  %vm107_vm1 = vcmask 64512   ;;  %v465_v5 = vld [vmem:[#allocation7 + $0x30] sm:$0xff]  ;;  %v464_v6 = vld [vmem:[#allocation7 + $0x28] sm:$0xff]  ;;  %s656_s28 = smov [#allocation11]  }
  0x18   :  { %122 = vmatpush.bf16.msra.mxu0 %v113_v3  ;;  %198 = vmatpush.bf16.msra.mxu1 %v466_v2  ;;  %v463_v7 = vld [vmem:[#allocation7 + $0x20] sm:$0xff]  ;;  %v462_v8 = vld [vmem:[#allocation7 + $0x18] sm:$0xff]  ;;  %v461_v9 = vld [vmem:[#allocation7 + $0x10] sm:$0xff]  ;;  %s348_s29 = sshll.u32 %s656_s28, 4  ;;  %s350_s9 = sshll.u32 %s728_s7, 4  ;;  %s349_s29 = int_to_ptr.vmem [resolvable:$true] %s348_s29  ;;  %s351_s9 = int_to_ptr.hbm [resolvable:$true] %s350_s9 }
  0x19   :  { %v460_v10 = vld [vmem:[#allocation7 + $0x8] sm:$0xff]  ;;  %v459_v11 = vld [vmem:[#allocation7] sm:$0xff]  ;;  %v453_v12 = vld [vmem:[#allocation10 + $0x70] sm:$0xf] }
  0x1a   :  { %v482_v13 = vld [vmem:[#allocation10 + $0x74] sm:$0xf0]  ;;  %v481_v14 = vld [vmem:[#allocation10 + $0x74] sm:$0xf]  ;;  %v455_v16 = vld [vmem:[#allocation10 + $0x78] sm:$0xf0] }
  0x1b   :  { %362 = vmatmul.msk.bf16.vlgmr.msra.gmra.mxu0 %vm107_vm1, %v101_v4  ;;  %v454_v15 = vor.u32 %v482_v13, %v453_v12  ;;  %v445_v17 = vld [vmem:[#allocation10 + $0x60] sm:$0xf]  ;;  %v480_v18 = vld [vmem:[#allocation10 + $0x64] sm:$0xf0]  ;;  %v458_v19 = vor.u32 %v481_v14, %v455_v16  ;;  %v479_v20 = vld [vmem:[#allocation10 + $0x64] sm:$0xf] }
  0x1c   :  { %199 = vmatpush.bf16.msra.mxu1 %v465_v5  ;;  %v447_v21 = vld [vmem:[#allocation10 + $0x68] sm:$0xf0]  ;;  %v446_v22 = vor.u32 %v480_v18, %v445_v17  ;;  %v437_v24 = vld [vmem:[#allocation10 + $0x50] sm:$0xf]  ;;  %v478_v25 = vld [vmem:[#allocation10 + $0x54] sm:$0xf0] }
  0x1d   :  { %315 = vmatpush.bf16.msra.mxu2 %v454_v15  ;;  %328 = vmatpush.bf16.msra.mxu3 %v458_v19  ;;  %v450_v23 = vor.u32 %v479_v20, %v447_v21  ;;  %v477_v26 = vld [vmem:[#allocation10 + $0x54] sm:$0xf]  ;;  %v439_v27 = vld [vmem:[#allocation10 + $0x58] sm:$0xf0]  ;;  %v438_v28 = vor.u32 %v478_v25, %v437_v24  ;;  %v429_v30 = vld [vmem:[#allocation10 + $0x40] sm:$0xf] }
  0x1e   :  { %v442_v29 = vor.u32 %v477_v26, %v439_v27  ;;  %v476_v31 = vld [vmem:[#allocation10 + $0x44] sm:$0xf0]  ;;  %v475_v32 = vld [vmem:[#allocation10 + $0x44] sm:$0xf]  ;;  %v431_v33 = vld [vmem:[#allocation10 + $0x48] sm:$0xf0] }
  0x1f   :  { %v430_v34 = vor.u32 %v476_v31, %v429_v30  ;;  %v434_v35 = vor.u32 %v475_v32, %v431_v33  ;;  %v421_v36 = vld [vmem:[#allocation10 + $0x30] sm:$0xf]  ;;  %v474_v37 = vld [vmem:[#allocation10 + $0x34] sm:$0xf0]  ;;  %v473_v38 = vld [vmem:[#allocation10 + $0x34] sm:$0xf] }
  0x20   :  { %200 = vmatpush.bf16.msra.mxu1 %v464_v6  ;;  %v423_v39 = vld [vmem:[#allocation10 + $0x38] sm:$0xf0]  ;;  %v422_v40 = vor.u32 %v474_v37, %v421_v36  ;;  %v413_v42 = vld [vmem:[#allocation10 + $0x20] sm:$0xf]  ;;  %v472_v43 = vld [vmem:[#allocation10 + $0x24] sm:$0xf0] }
  0x21   :  { %316 = vmatpush.bf16.msra.mxu2 %v446_v22  ;;  %329 = vmatpush.bf16.msra.mxu3 %v450_v23  ;;  %v426_v41 = vor.u32 %v473_v38, %v423_v39  ;;  %v471_v44 = vld [vmem:[#allocation10 + $0x24] sm:$0xf]  ;;  %v415_v45 = vld [vmem:[#allocation10 + $0x28] sm:$0xf0]  ;;  %v414_v46 = vor.u32 %v472_v43, %v413_v42  ;;  %v493_v48 = vld [vmem:[%s723_s2] ss:$0 sm:$0xff] }
  0x22   :  { %v418_v47 = vor.u32 %v471_v44, %v415_v45  ;;  %v405_v54 = vld [vmem:[#allocation10 + $0x10] sm:$0xf]  ;;  %v470_v55 = vld [vmem:[#allocation10 + $0x14] sm:$0xf0]  ;;  %v469_v56 = vld [vmem:[#allocation10 + $0x14] sm:$0xf] }
  0x23   :  { %v406_v57 = vor.u32 %v470_v55, %v405_v54  ;;  %v407_v58 = vld [vmem:[#allocation10 + $0x18] sm:$0xf0]  ;;  %v397_v60 = vld [vmem:[#allocation10] sm:$0xf]  ;;  %v468_v61 = vld [vmem:[#allocation10 + $0x4] sm:$0xf0] }
  0x24   :  { %201 = vmatpush.bf16.msra.mxu1 %v463_v7  ;;  %v410_v59 = vor.u32 %v469_v56, %v407_v58  ;;  %v467_v62 = vld [vmem:[#allocation10 + $0x4] sm:$0xf]  ;;  %v398_v63 = vor.u32 %v468_v61, %v397_v60  ;;  %v399_v0 = vld [vmem:[#allocation10 + $0x8] sm:$0xf0]  ;;  %v494_v2 = vld [vmem:[#allocation8] ss:$0 sm:$0xff] }
  0x25   :  { %317 = vmatpush.bf16.msra.mxu2 %v438_v28  ;;  %330 = vmatpush.bf16.msra.mxu3 %v442_v29  ;;  %v402_v1 = vor.u32 %v467_v62, %v399_v0 }
  0x28   :  { %202 = vmatpush.bf16.msra.mxu1 %v462_v8  ;;  %v229_v8 = vld [vmem:[%s727_s6] sm:$0x3] }
  0x29   :  { %318 = vmatpush.bf16.msra.mxu2 %v430_v34  ;;  %331 = vmatpush.bf16.msra.mxu3 %v434_v35 }
  0x2c   :  { %203 = vmatpush.bf16.msra.mxu1 %v461_v9  ;;  %v231_v9 = vperm.slane %v229_v8, 0 }
  0x2d   :  { %319 = vmatpush.bf16.msra.mxu2 %v422_v40  ;;  %332 = vmatpush.bf16.msra.mxu3 %v426_v41 }
  0x30   :  { %204 = vmatpush.bf16.msra.mxu1 %v460_v10  ;;  %v232_v10 = vperm.slane %v229_v8, 1 }
  0x31   :  { %320 = vmatpush.bf16.msra.mxu2 %v414_v46  ;;  %333 = vmatpush.bf16.msra.mxu3 %v418_v47 }
  0x34   :  { %205 = vmatpush.bf16.msra.mxu1 %v459_v11 }
  0x35   :  { %321 = vmatpush.bf16.msra.mxu2 %v406_v57  ;;  %334 = vmatpush.bf16.msra.mxu3 %v410_v59 }
  0x39   :  { %322 = vmatpush.bf16.msra.mxu2 %v398_v63  ;;  %335 = vmatpush.bf16.msra.mxu3 %v402_v1 }
  0x98   :  { %v124_v49 = vpop.f32.mrf.mxu0 }
  0x99   :  { %v125_v50 = vadd.f32 %v493_v48, %v124_v49 }
  0x9b   :  { %v128_v51 = vmax.f32 %v125_v50, 0.0 }
  0x9d   :  { %v129_v52 = vpack.c.bf16 %v128_v51, %v128_v51 }
  0x9f   :  { %206 = vmatmul.bf16.vlgmr.msra.gmra.mxu1 %v129_v52 }
  0xa0   :  { %v126_v53 = vpop.f32.mrf.mxu0 }
 0x11c   :  { %v207_v3 = vpop.f32.mrf.mxu1 }
 0x11d   :  { %v208_v4 = vadd.f32 %v494_v2, %v207_v3 }
 0x11f   :  { %v211_v5 = vmax.f32 %v208_v4, 0.0 }
 0x121   :  { %v212_v6 = vpack.c.bf16 %v211_v5, %v211_v5 }
 0x123   :  { %323 = vmatmul.bf16.vlgmr.msra.gmra.mxu2 %v212_v6  ;;  %336 = vmatmul.bf16.vlgmr.msra.gmra.mxu3 %v212_v6 }
 0x124   :  { %v209_v7 = vpop.f32.mrf.mxu1 }
 0x1a6   :  { %v324_v11 = vpop.f32.mrf.mxu2  ;;  %v337_v12 = vpop.f32.mrf.mxu3 }
 0x1a7   :  { %v325_v13 = vadd.f32 %v324_v11, %v231_v9  ;;  %v338_v14 = vadd.f32 %v337_v12, %v232_v10 }
 0x1a9   :  { %v341_v15 = vpack.c.bf16 %v338_v14, %v325_v13 }
 0x1ab   :  { %342 = vst [vmem:[#allocation11] sm:$0xff] %v341_v15 }
 0x1ac   :  { %353 = dma.vmem_to_hbm [thread:$0]  %s349_s29, 128, %s351_s9, [#allocation4]  }
 0x1ae   :  { %v326_v16 = vpop.f32.mrf.mxu2  ;;  %v339_v17 = vpop.f32.mrf.mxu3 }
 0x1af   :  { %645 = dma.done.wait [#allocation4], 128  }
 0x1b0   :  { %646 = vsyncadd [#allocation4], 4294967168 }
 0x1b1   :  { %358 = vsyncpa [#allocation3], 1 }
 0x1b2   :  { %359 = vsyncpa [#allocation6], 1 }
 0x1b3   :  { %360 = vsyncpa [#allocation9], 1 }
 0x1b4   :  { %361 = vsyncpa [#allocation4], 1 }

// kernel: tpu_custom_call.1
= control target key start
LH: loop header
LB: loop body
LE: loop exit
PB: predicated region body
PF: predicated region fallthrough
CT: control target
= control target key end

     0   :  { %12 = vsyncpa [#allocation3], 0  ;;  %s721_s0 = inlined_call_operand.hbm [shape: f32[8,8], index: 0, kind: input, shape index: {}]   ;;  %s722_s1 = inlined_call_operand.hbm [shape: bf16[8,128], index: 1, kind: input, shape index: {}]   ;;  %s723_s2 = inlined_call_operand.vmem [shape: f32[1,128], index: 2, kind: input, shape index: {}]   ;;  %s724_s3 = inlined_call_operand.hbm [shape: bf16[128,128], index: 3, kind: input, shape index: {}]   ;;  %s725_s4 = inlined_call_operand.hbm [shape: f32[1,128], index: 4, kind: input, shape index: {}]   ;;  %s726_s5 = inlined_call_operand.hbm [shape: bf16[128,256], index: 5, kind: input, shape index: {}]   ;;  %s727_s6 = inlined_call_operand.vmem [shape: f32[1,256], index: 6, kind: input, shape index: {}]   ;;  %s728_s7 = inlined_call_operand.hbm [shape: bf16[8,256], index: 7, kind: output, shape index: {}]  }
   0x1   :  { %13 = vsyncpa [#allocation6], 0 }
   0x2   :  { %14 = vsyncpa [#allocation9], 0  ;;  %s32_s26 = sshll.u32 %s722_s1, 4  ;;  %s33_s26 = int_to_ptr.hbm [resolvable:$true] %s32_s26 }
   0x3   :  { %15 = vsyncpa [#allocation4], 0  ;;  %s647_s27 = smov [#allocation5]   ;;  %s58_s8 = sshll.u32 %s725_s4, 4  ;;  %s59_s8 = int_to_ptr.hbm [resolvable:$true] %s58_s8 }
   0x4   :  { %s34_s28 = sshll.u32 %s647_s27, 4  ;;  %s648_s9 = smov [#allocation8]   ;;  %s35_s28 = int_to_ptr.vmem [resolvable:$true] %s34_s28 }
   0x5   :  { %37 = dma.hbm_to_vmem [thread:$0]  %s33_s26, 64, %s35_s28, [#allocation6]  }
   0x6   :  { %s60_s10 = sshll.u32 %s648_s9, 4  ;;  %s21_s13 = sshll.u32 %s721_s0, 4  ;;  %s61_s10 = int_to_ptr.vmem [resolvable:$true] %s60_s10  ;;  %s22_s13 = int_to_ptr.hbm [resolvable:$true] %s21_s13 }
   0x7   :  { %63 = dma.hbm_to_vmem [thread:$0]  %s59_s8, 16, %s61_s10, [#allocation9]  }
   0x8   :  { %s44_s15 = sshll.u32 %s724_s3, 4  ;;  %s649_s16 = smov [#allocation2]   ;;  %s45_s15 = int_to_ptr.hbm [resolvable:$true] %s44_s15 }
   0x9   :  { %s23_s17 = sshll.u32 %s649_s16, 4  ;;  %s650_s4 = smov [#allocation7]   ;;  %s24_s17 = int_to_ptr.vmem [resolvable:$true] %s23_s17 }
   0xa   :  { %26 = dma.hbm_to_vmem [thread:$0]  %s22_s13, 128, %s24_s17, [#allocation3]  }
   0xb   :  { %s46_s18 = sshll.u32 %s650_s4, 4  ;;  %s651_s19 = smov 64   ;;  %s47_s18 = int_to_ptr.vmem [resolvable:$true] %s46_s18 }
   0xc   :  { %s652_s20 = smov 4   ;;  %s68_s22 = sshll.u32 %s726_s5, 4  ;;  %s69_s22 = int_to_ptr.hbm [resolvable:$true] %s68_s22 }
   0xd   :  { %52 = dma.hbm_to_vmem [thread:$0]  %s45_s15, 1024, %s47_s18, [#allocation6], %s651_s19, %s651_s19, %s652_s20  }
   0xe   :  { %s653_s23 = smov [#allocation10]   ;;  %s654_s3 = smov 128  }
   0xf   :  { %s70_s24 = sshll.u32 %s653_s23, 4  ;;  %s655_s25 = smov 8   ;;  %s71_s24 = int_to_ptr.vmem [resolvable:$true] %s70_s24 }
  0x10   :  { %76 = dma.hbm_to_vmem [thread:$0]  %s69_s22, 2048, %s71_s24, [#allocation9], %s654_s3, %s654_s3, %s655_s25  }
  0x11   :  { %639 = dma.done.wait [#allocation3], 128  }
  0x12   :  { %640 = vsyncadd [#allocation3], 4294967168 }
  0x13   :  { %641 = dma.done.wait [#allocation6], 1088  }
  0x14   :  { %642 = vsyncadd [#allocation6], 4294966208 }
  0x15   :  { %643 = dma.done.wait [#allocation9], 2064  }
  0x16   :  { %644 = vsyncadd [#allocation9], 4294965232  ;;  %vm111_vm0 = vcmask 1043456   ;;  %v102_v0 = vld [vmem:[#allocation5] sm:$0xf]  ;;  %v100_v1 = vld [vmem:[#allocation2] sm:$0xff] }
  0x17   :  { %v466_v2 = vld [vmem:[#allocation7 + $0x38] sm:$0xff]  ;;  %v113_v3 = vsel %vm111_vm0, %v102_v0, 0  ;;  %v101_v4 = vpack.c.bf16 %v100_v1, %v100_v1  ;;  %vm107_vm1 = vcmask 64512   ;;  %v465_v5 = vld [vmem:[#allocation7 + $0x30] sm:$0xff]  ;;  %v464_v6 = vld [vmem:[#allocation7 + $0x28] sm:$0xff]  ;;  %s656_s28 = smov [#allocation11]  }
  0x18   :  { %122 = vmatpush.bf16.msra.mxu0 %v113_v3  ;;  %198 = vmatpush.bf16.msra.mxu1 %v466_v2  ;;  %v463_v7 = vld [vmem:[#allocation7 + $0x20] sm:$0xff]  ;;  %v462_v8 = vld [vmem:[#allocation7 + $0x18] sm:$0xff]  ;;  %v461_v9 = vld [vmem:[#allocation7 + $0x10] sm:$0xff]  ;;  %s348_s29 = sshll.u32 %s656_s28, 4  ;;  %s350_s9 = sshll.u32 %s728_s7, 4  ;;  %s349_s29 = int_to_ptr.vmem [resolvable:$true] %s348_s29  ;;  %s351_s9 = int_to_ptr.hbm [resolvable:$true] %s350_s9 }
  0x19   :  { %v460_v10 = vld [vmem:[#allocation7 + $0x8] sm:$0xff]  ;;  %v459_v11 = vld [vmem:[#allocation7] sm:$0xff]  ;;  %v453_v12 = vld [vmem:[#allocation10 + $0x70] sm:$0xf] }
  0x1a   :  { %v482_v13 = vld [vmem:[#allocation10 + $0x74] sm:$0xf0]  ;;  %v481_v14 = vld [vmem:[#allocation10 + $0x74] sm:$0xf]  ;;  %v455_v16 = vld [vmem:[#allocation10 + $0x78] sm:$0xf0] }
  0x1b   :  { %362 = vmatmul.msk.bf16.vlgmr.msra.gmra.mxu0 %vm107_vm1, %v101_v4  ;;  %v454_v15 = vor.u32 %v482_v13, %v453_v12  ;;  %v445_v17 = vld [vmem:[#allocation10 + $0x60] sm:$0xf]  ;;  %v480_v18 = vld [vmem:[#allocation10 + $0x64] sm:$0xf0]  ;;  %v458_v19 = vor.u32 %v481_v14, %v455_v16  ;;  %v479_v20 = vld [vmem:[#allocation10 + $0x64] sm:$0xf] }
  0x1c   :  { %199 = vmatpush.bf16.msra.mxu1 %v465_v5  ;;  %v447_v21 = vld [vmem:[#allocation10 + $0x68] sm:$0xf0]  ;;  %v446_v22 = vor.u32 %v480_v18, %v445_v17  ;;  %v437_v24 = vld [vmem:[#allocation10 + $0x50] sm:$0xf]  ;;  %v478_v25 = vld [vmem:[#allocation10 + $0x54] sm:$0xf0] }
  0x1d   :  { %315 = vmatpush.bf16.msra.mxu2 %v454_v15  ;;  %328 = vmatpush.bf16.msra.mxu3 %v458_v19  ;;  %v450_v23 = vor.u32 %v479_v20, %v447_v21  ;;  %v477_v26 = vld [vmem:[#allocation10 + $0x54] sm:$0xf]  ;;  %v439_v27 = vld [vmem:[#allocation10 + $0x58] sm:$0xf0]  ;;  %v438_v28 = vor.u32 %v478_v25, %v437_v24  ;;  %v429_v30 = vld [vmem:[#allocation10 + $0x40] sm:$0xf] }
  0x1e   :  { %v442_v29 = vor.u32 %v477_v26, %v439_v27  ;;  %v476_v31 = vld [vmem:[#allocation10 + $0x44] sm:$0xf0]  ;;  %v475_v32 = vld [vmem:[#allocation10 + $0x44] sm:$0xf]  ;;  %v431_v33 = vld [vmem:[#allocation10 + $0x48] sm:$0xf0] }
  0x1f   :  { %v430_v34 = vor.u32 %v476_v31, %v429_v30  ;;  %v434_v35 = vor.u32 %v475_v32, %v431_v33  ;;  %v421_v36 = vld [vmem:[#allocation10 + $0x30] sm:$0xf]  ;;  %v474_v37 = vld [vmem:[#allocation10 + $0x34] sm:$0xf0]  ;;  %v473_v38 = vld [vmem:[#allocation10 + $0x34] sm:$0xf] }
  0x20   :  { %200 = vmatpush.bf16.msra.mxu1 %v464_v6  ;;  %v423_v39 = vld [vmem:[#allocation10 + $0x38] sm:$0xf0]  ;;  %v422_v40 = vor.u32 %v474_v37, %v421_v36  ;;  %v413_v42 = vld [vmem:[#allocation10 + $0x20] sm:$0xf]  ;;  %v472_v43 = vld [vmem:[#allocation10 + $0x24] sm:$0xf0] }
  0x21   :  { %316 = vmatpush.bf16.msra.mxu2 %v446_v22  ;;  %329 = vmatpush.bf16.msra.mxu3 %v450_v23  ;;  %v426_v41 = vor.u32 %v473_v38, %v423_v39  ;;  %v471_v44 = vld [vmem:[#allocation10 + $0x24] sm:$0xf]  ;;  %v415_v45 = vld [vmem:[#allocation10 + $0x28] sm:$0xf0]  ;;  %v414_v46 = vor.u32 %v472_v43, %v413_v42  ;;  %v493_v48 = vld [vmem:[%s723_s2] ss:$0 sm:$0xff] }
  0x22   :  { %v418_v47 = vor.u32 %v471_v44, %v415_v45  ;;  %v405_v54 = vld [vmem:[#allocation10 + $0x10] sm:$0xf]  ;;  %v470_v55 = vld [vmem:[#allocation10 + $0x14] sm:$0xf0]  ;;  %v469_v56 = vld [vmem:[#allocation10 + $0x14] sm:$0xf] }
  0x23   :  { %v406_v57 = vor.u32 %v470_v55, %v405_v54  ;;  %v407_v58 = vld [vmem:[#allocation10 + $0x18] sm:$0xf0]  ;;  %v397_v60 = vld [vmem:[#allocation10] sm:$0xf]  ;;  %v468_v61 = vld [vmem:[#allocation10 + $0x4] sm:$0xf0] }
  0x24   :  { %201 = vmatpush.bf16.msra.mxu1 %v463_v7  ;;  %v410_v59 = vor.u32 %v469_v56, %v407_v58  ;;  %v467_v62 = vld [vmem:[#allocation10 + $0x4] sm:$0xf]  ;;  %v398_v63 = vor.u32 %v468_v61, %v397_v60  ;;  %v399_v0 = vld [vmem:[#allocation10 + $0x8] sm:$0xf0]  ;;  %v494_v2 = vld [vmem:[#allocation8] ss:$0 sm:$0xff] }
  0x25   :  { %317 = vmatpush.bf16.msra.mxu2 %v438_v28  ;;  %330 = vmatpush.bf16.msra.mxu3 %v442_v29  ;;  %v402_v1 = vor.u32 %v467_v62, %v399_v0 }
  0x28   :  { %202 = vmatpush.bf16.msra.mxu1 %v462_v8  ;;  %v229_v8 = vld [vmem:[%s727_s6] sm:$0x3] }
  0x29   :  { %318 = vmatpush.bf16.msra.mxu2 %v430_v34  ;;  %331 = vmatpush.bf16.msra.mxu3 %v434_v35 }
  0x2c   :  { %203 = vmatpush.bf16.msra.mxu1 %v461_v9  ;;  %v231_v9 = vperm.slane %v229_v8, 0 }
  0x2d   :  { %319 = vmatpush.bf16.msra.mxu2 %v422_v40  ;;  %332 = vmatpush.bf16.msra.mxu3 %v426_v41 }
  0x30   :  { %204 = vmatpush.bf16.msra.mxu1 %v460_v10  ;;  %v232_v10 = vperm.slane %v229_v8, 1 }
  0x31   :  { %320 = vmatpush.bf16.msra.mxu2 %v414_v46  ;;  %333 = vmatpush.bf16.msra.mxu3 %v418_v47 }
  0x34   :  { %205 = vmatpush.bf16.msra.mxu1 %v459_v11 }
  0x35   :  { %321 = vmatpush.bf16.msra.mxu2 %v406_v57  ;;  %334 = vmatpush.bf16.msra.mxu3 %v410_v59 }
  0x39   :  { %322 = vmatpush.bf16.msra.mxu2 %v398_v63  ;;  %335 = vmatpush.bf16.msra.mxu3 %v402_v1 }
  0x98   :  { %v124_v49 = vpop.f32.mrf.mxu0 }
  0x99   :  { %v125_v50 = vadd.f32 %v493_v48, %v124_v49 }
  0x9b   :  { %v128_v51 = vmax.f32 %v125_v50, 0.0 }
  0x9d   :  { %v129_v52 = vpack.c.bf16 %v128_v51, %v128_v51 }
  0x9f   :  { %206 = vmatmul.bf16.vlgmr.msra.gmra.mxu1 %v129_v52 }
  0xa0   :  { %v126_v53 = vpop.f32.mrf.mxu0 }
 0x11c   :  { %v207_v3 = vpop.f32.mrf.mxu1 }
 0x11d   :  { %v208_v4 = vadd.f32 %v494_v2, %v207_v3 }
 0x11f   :  { %v211_v5 = vmax.f32 %v208_v4, 0.0 }
 0x121   :  { %v212_v6 = vpack.c.bf16 %v211_v5, %v211_v5 }
 0x123   :  { %323 = vmatmul.bf16.vlgmr.msra.gmra.mxu2 %v212_v6  ;;  %336 = vmatmul.bf16.vlgmr.msra.gmra.mxu3 %v212_v6 }
 0x124   :  { %v209_v7 = vpop.f32.mrf.mxu1 }
 0x1a6   :  { %v324_v11 = vpop.f32.mrf.mxu2  ;;  %v337_v12 = vpop.f32.mrf.mxu3 }
 0x1a7   :  { %v325_v13 = vadd.f32 %v324_v11, %v231_v9  ;;  %v338_v14 = vadd.f32 %v337_v12, %v232_v10 }
 0x1a9   :  { %v341_v15 = vpack.c.bf16 %v338_v14, %v325_v13 }
 0x1ab   :  { %342 = vst [vmem:[#allocation11] sm:$0xff] %v341_v15 }
 0x1ac   :  { %353 = dma.vmem_to_hbm [thread:$0]  %s349_s29, 128, %s351_s9, [#allocation4]  }
 0x1ae   :  { %v326_v16 = vpop.f32.mrf.mxu2  ;;  %v339_v17 = vpop.f32.mrf.mxu3 }
 0x1af   :  { %645 = dma.done.wait [#allocation4], 128  }
 0x1b0   :  { %646 = vsyncadd [#allocation4], 4294967168 }
 0x1b1   :  { %358 = vsyncpa [#allocation3], 1 }
 0x1b2   :  { %359 = vsyncpa [#allocation6], 1 }
 0x1b3   :  { %360 = vsyncpa [#allocation9], 1 }
 0x1b4   :  { %361 = vsyncpa [#allocation4], 1 }

</bundles_post_ra>
